<compile_context>
chip_gen: v5e
topology: v5e:2x2
jax: 0.10.0
libtpu: 0.0.40
codegen_flags: <defaults>
</compile_context>

<pallas_src>
import random

import numpy as np
import jax
import jax.numpy as jnp
from jax.experimental import pallas as pl
from jax.experimental.pallas import tpu as pltpu

MU = 136.72353790613718
SIGMA = 62.34640414043511
MARGIN = 0.5
EPS = 1e-6  # torch.nn.functional.pairwise_distance default eps
LANE = 128


def triplet_kernel(feat_ref, lab_ref, loss_ref):
    # feat_ref: (3*Dp, bt)  rows = [anchor | partner1 | partner2] channels
    # lab_ref : (3*Lp, bt)  rows = [anchor | partner1 | partner2] label dims
    # loss_ref: (1, bt)     per-row loss, lane-dense
    dp = feat_ref.shape[0] // 3
    lp = lab_ref.shape[0] // 3

    a = feat_ref[0:dp, :]
    f1 = feat_ref[dp:2 * dp, :]
    f2 = feat_ref[2 * dp:3 * dp, :]

    li = lab_ref[0:lp, :]
    l1 = lab_ref[lp:2 * lp, :]
    l2 = lab_ref[2 * lp:3 * lp, :]

    # nn.L1Loss(reduction='sum') per row (f32, sublane reduction -> (1, bt)).
    d1 = jnp.sum(jnp.abs(li - l1), axis=0, keepdims=True)
    d2 = jnp.sum(jnp.abs(li - l2), axis=0, keepdims=True)
    cond = d1 >= d2                                            # (1, bt)

    # Euclidean distances to BOTH candidate partners, then select on the reduced
    # vectors (cheaper than selecting full (D, bt) feature tiles).
    d_a1 = jnp.sqrt(jnp.sum((a - f1 + EPS) ** 2, axis=0, keepdims=True))
    d_a2 = jnp.sqrt(jnp.sum((a - f2 + EPS) ** 2, axis=0, keepdims=True))

    d_ap = jnp.where(cond, d_a2, d_a1)   # near = f2 when d1 >= d2
    d_an = jnp.where(cond, d_a1, d_a2)   # far  = f1 when d1 >= d2

    # TripletMarginLoss(margin=0.5, p=2): relu(d_ap - d_an + margin)
    loss_ref[...] = jnp.maximum(d_ap - d_an + MARGIN, 0.0)


def triplet_loss3(features, label, idx1, idx2, *, b_tile_max=4096):
    """features: (B, D), label: (B, L), idx1/idx2: (B,) int32 partner indices."""
    B, _ = features.shape

    f = features.astype(jnp.float32)
    lab = label.astype(jnp.float32)
    idx1 = idx1.astype(jnp.int32)
    idx2 = idx2.astype(jnp.int32)

    # Dense gathers of the partner rows (XLA side).
    f1 = f[idx1]
    f2 = f[idx2]
    l1 = lab[idx1]
    l2 = lab[idx2]

    # label[j] was normalized in place at iteration j, so a partner with j < i is
    # seen already-normalized.  Fold that correction into the gather output here
    # (elementwise on the gather result -> fuses, no extra HBM pass, no kernel
    # index inputs needed).
    row = jnp.arange(B, dtype=jnp.int32)[:, None]
    l1 = jnp.where(idx1[:, None] < row, (l1 - MU) / SIGMA, l1)
    l2 = jnp.where(idx2[:, None] < row, (l2 - MU) / SIGMA, l2)

    # ---- lane-dense layout: batch on lanes, channels on sublanes ----
    def subl_pad(x_t, fill):
        r = (-x_t.shape[0]) % 8
        if r:
            x_t = jnp.pad(x_t, ((0, r), (0, 0)), constant_values=fill)
        return x_t

    # Anchor channels padded with 0, partner channels padded with EPS so that
    # (a - p + EPS) == 0 exactly on padded channels (no contribution to the norm).
    a_t = subl_pad(f.T, 0.0)
    f1_t = subl_pad(f1.T, EPS)
    f2_t = subl_pad(f2.T, EPS)
    li_t = subl_pad(lab.T, 0.0)
    l1_t = subl_pad(l1.T, 0.0)
    l2_t = subl_pad(l2.T, 0.0)

    feats = jnp.concatenate([a_t, f1_t, f2_t], axis=0)     # (3*Dp, B)
    labs = jnp.concatenate([li_t, l1_t, l2_t], axis=0)     # (3*Lp, B)

    # ---- batch (lane) tiling ----
    def rup(x, m):
        return ((x + m - 1) // m) * m

    b_tile_max = max(LANE, (b_tile_max // LANE) * LANE)     # keep 128-lane multiple
    # >= 2 tiles whenever B is big enough so the 'parallel' axis shards across
    # v7x's two TensorCores; always a multiple of 128 lanes.
    target_tiles = 2 if B > LANE else 1
    bt = min(b_tile_max, max(LANE, rup(pl.cdiv(B, target_tiles), LANE)))
    b_pad = rup(B, bt)
    num_tiles = b_pad // bt

    def lane_pad(x):
        if x.shape[1] == b_pad:
            return x
        return jnp.pad(x, ((0, 0), (0, b_pad - x.shape[1])))

    feats = lane_pad(feats)
    labs = lane_pad(labs)

    losses = pl.pallas_call(
        triplet_kernel,
        out_shape=jax.ShapeDtypeStruct((1, b_pad), jnp.float32),
        grid_spec=pltpu.PrefetchScalarGridSpec(
            num_scalar_prefetch=0,
            grid=(num_tiles,),
            in_specs=[
                pl.BlockSpec((feats.shape[0], bt), lambda t: (0, t)),
                pl.BlockSpec((labs.shape[0], bt), lambda t: (0, t)),
            ],
            out_specs=pl.BlockSpec((1, bt), lambda t: (0, t)),
        ),
        # ~0.5 KiB/row double-buffered -> well under every generation's scoped
        # VMEM default even at bt=4096, so no vmem_limit_bytes override needed.
        compiler_params=pltpu.CompilerParams(
            dimension_semantics=("parallel",)),
    )(feats, labs)

    # Padded lanes were never part of the batch; slice them out before the sum.
    return jnp.sum(losses[0, :B])


def _sample_indices(batch_size, seed=0):
    """Deterministic replay of the module's `random.sample` index selection."""
    rng = random.Random(seed)
    i1_l, i2_l = [], []
    for i in range(batch_size):
        a, b = rng.sample(range(batch_size), 2)
        while a == i or b == i:
            a, b = rng.sample(range(batch_size), 2)
        i1_l.append(a)
        i2_l.append(b)
    return i1_l, i2_l


def _reference(features, label, idx1_l, idx2_l):
    """Pure-numpy replay of the PyTorch loop (incl. in-place label mutation)."""
    fn = np.asarray(features, dtype=np.float64)
    ln = np.asarray(label, dtype=np.float64).copy()
    total = 0.0
    for i in range(fn.shape[0]):
        a_i, b_i = idx1_l[i], idx2_l[i]
        d1 = np.abs(ln[i] - ln[a_i]).sum()
        d2 = np.abs(ln[i] - ln[b_i]).sum()
        if d1 >= d2:
            near, far = fn[b_i], fn[a_i]
        else:
            near, far = fn[a_i], fn[b_i]
        ln[i] = (ln[i] - MU) / SIGMA
        d_ap = np.sqrt(((fn[i] - near + EPS) ** 2).sum())
        d_an = np.sqrt(((fn[i] - far + EPS) ** 2).sum())
        total += max(d_ap - d_an + MARGIN, 0.0)
    return total


if __name__ == "__main__":
    # Small case (single 128-lane tile path).
    BATCH_SIZE, D, L = 4, 32, 8
    key = jax.random.PRNGKey(0)
    kf, kl = jax.random.split(key)
    features = jax.random.normal(kf, (BATCH_SIZE, D), dtype=jnp.float32)
    label = jax.random.uniform(kl, (BATCH_SIZE, L), dtype=jnp.float32,
                               minval=0.0, maxval=255.0)
    i1_l, i2_l = _sample_indices(BATCH_SIZE, seed=0)
    idx1 = jnp.array(i1_l, dtype=jnp.int32)
    idx2 = jnp.array(i2_l, dtype=jnp.int32)

    out = jax.block_until_ready(triplet_loss3(features, label, idx1, idx2))
    ref = _reference(features, label, i1_l, i2_l)
    np.testing.assert_allclose(float(out), ref, rtol=1e-4, atol=1e-3)

    # Multi-tile case (B > 128 -> two 'parallel' batch-lane tiles, padded lanes).
    B2 = 200
    kf2, kl2 = jax.random.split(jax.random.PRNGKey(1))
    features2 = jax.random.normal(kf2, (B2, D), dtype=jnp.float32)
    label2 = jax.random.uniform(kl2, (B2, L), dtype=jnp.float32,
                                minval=0.0, maxval=255.0)
    i1_l2, i2_l2 = _sample_indices(B2, seed=1)
    out2 = jax.block_until_ready(
        triplet_loss3(features2, label2,
                      jnp.array(i1_l2, dtype=jnp.int32),
                      jnp.array(i2_l2, dtype=jnp.int32)))
    ref2 = _reference(features2, label2, i1_l2, i2_l2)
    np.testing.assert_allclose(float(out2), ref2, rtol=1e-4, atol=1e-3)

    print("KERNEL_OK")
</pallas_src>

<mosaic_0001>
module attributes {stable_mosaic.version = 11 : i64} {
  func.func @triplet_kernel(%arg0: i32, %arg1: memref<96x128xf32, #tpu.memory_space<vmem>>, %arg2: memref<24x128xf32, #tpu.memory_space<vmem>>, %arg3: memref<1x128xf32, #tpu.memory_space<vmem>>) attributes {dimension_semantics = [#tpu.dimension_semantics<parallel>], iteration_bounds = array<i64: 1>, scalar_prefetch = 0 : i64, scratch_operands = 0 : i64, tpu.core_type = #tpu.core_type<tc>, window_params = [{transform_indices = @transform_0, window_bounds = array<i64: 96, 128>}, {transform_indices = @transform_1, window_bounds = array<i64: 24, 128>}, {transform_indices = @transform_2, window_bounds = array<i64: 1, 128>}]} {
    %c0 = arith.constant 0 : index
    %c0_0 = arith.constant 0 : index
    %0 = vector.load %arg1[%c0, %c0_0] : memref<96x128xf32, #tpu.memory_space<vmem>>, vector<32x128xf32>
    %c32 = arith.constant 32 : index
    %c0_1 = arith.constant 0 : index
    %1 = vector.load %arg1[%c32, %c0_1] : memref<96x128xf32, #tpu.memory_space<vmem>>, vector<32x128xf32>
    %c64 = arith.constant 64 : index
    %c0_2 = arith.constant 0 : index
    %2 = vector.load %arg1[%c64, %c0_2] : memref<96x128xf32, #tpu.memory_space<vmem>>, vector<32x128xf32>
    %c0_3 = arith.constant 0 : index
    %c0_4 = arith.constant 0 : index
    %3 = vector.load %arg2[%c0_3, %c0_4] : memref<24x128xf32, #tpu.memory_space<vmem>>, vector<8x128xf32>
    %c8 = arith.constant 8 : index
    %c0_5 = arith.constant 0 : index
    %4 = vector.load %arg2[%c8, %c0_5] : memref<24x128xf32, #tpu.memory_space<vmem>>, vector<8x128xf32>
    %c16 = arith.constant 16 : index
    %c0_6 = arith.constant 0 : index
    %5 = vector.load %arg2[%c16, %c0_6] : memref<24x128xf32, #tpu.memory_space<vmem>>, vector<8x128xf32>
    %6 = arith.subf %3, %4 : vector<8x128xf32>
    %7 = math.absf %6 : vector<8x128xf32>
    %cst = arith.constant dense<0.000000e+00> : vector<128xf32>
    %8 = vector.multi_reduction <add>, %7, %cst [0] : vector<8x128xf32> to vector<128xf32>
    %9 = vector.shape_cast %8 : vector<128xf32> to vector<1x128xf32>
    %10 = arith.subf %3, %5 : vector<8x128xf32>
    %11 = math.absf %10 : vector<8x128xf32>
    %cst_7 = arith.constant dense<0.000000e+00> : vector<128xf32>
    %12 = vector.multi_reduction <add>, %11, %cst_7 [0] : vector<8x128xf32> to vector<128xf32>
    %13 = vector.shape_cast %12 : vector<128xf32> to vector<1x128xf32>
    %14 = arith.cmpf oge, %9, %13 : vector<1x128xf32>
    %15 = arith.subf %0, %1 : vector<32x128xf32>
    %cst_8 = arith.constant 9.99999997E-7 : f32
    %16 = vector.broadcast %cst_8 : f32 to vector<32x128xf32>
    %17 = arith.addf %15, %16 : vector<32x128xf32>
    %18 = arith.mulf %17, %17 : vector<32x128xf32>
    %cst_9 = arith.constant dense<0.000000e+00> : vector<128xf32>
    %19 = vector.multi_reduction <add>, %18, %cst_9 [0] : vector<32x128xf32> to vector<128xf32>
    %20 = vector.shape_cast %19 : vector<128xf32> to vector<1x128xf32>
    %21 = math.sqrt %20 : vector<1x128xf32>
    %22 = arith.subf %0, %2 : vector<32x128xf32>
    %cst_10 = arith.constant 9.99999997E-7 : f32
    %23 = vector.broadcast %cst_10 : f32 to vector<32x128xf32>
    %24 = arith.addf %22, %23 : vector<32x128xf32>
    %25 = arith.mulf %24, %24 : vector<32x128xf32>
    %cst_11 = arith.constant dense<0.000000e+00> : vector<128xf32>
    %26 = vector.multi_reduction <add>, %25, %cst_11 [0] : vector<32x128xf32> to vector<128xf32>
    %27 = vector.shape_cast %26 : vector<128xf32> to vector<1x128xf32>
    %28 = math.sqrt %27 : vector<1x128xf32>
    %29 = arith.select %14, %28, %21 : vector<1x128xi1>, vector<1x128xf32>
    %30 = arith.select %14, %21, %28 : vector<1x128xi1>, vector<1x128xf32>
    %31 = arith.subf %29, %30 : vector<1x128xf32>
    %cst_12 = arith.constant 5.000000e-01 : f32
    %32 = vector.broadcast %cst_12 : f32 to vector<1x128xf32>
    %33 = arith.addf %31, %32 : vector<1x128xf32>
    %cst_13 = arith.constant 0.000000e+00 : f32
    %34 = vector.broadcast %cst_13 : f32 to vector<1x128xf32>
    %35 = arith.maximumf %33, %34 : vector<1x128xf32>
    %c0_14 = arith.constant 0 : index
    %c0_15 = arith.constant 0 : index
    %36 = vector.load %arg3[%c0_14, %c0_15] : memref<1x128xf32, #tpu.memory_space<vmem>>, vector<1x128xf32>
    tpu.vector_store %arg3[%c0_14, %c0_15], %35 {strides = array<i32>} : memref<1x128xf32, #tpu.memory_space<vmem>>, vector<1x128xf32>,
    return
  }
  func.func @transform_0(%arg0: i32) -> (i32, i32) {
    %c0_i32 = arith.constant 0 : i32
    %c0_i32_0 = arith.constant 0 : i32
    return %c0_i32, %arg0 : i32, i32
  }
  func.func @transform_1(%arg0: i32) -> (i32, i32) {
    %c0_i32 = arith.constant 0 : i32
    %c0_i32_0 = arith.constant 0 : i32
    return %c0_i32, %arg0 : i32, i32
  }
  func.func @transform_2(%arg0: i32) -> (i32, i32) {
    %c0_i32 = arith.constant 0 : i32
    %c0_i32_0 = arith.constant 0 : i32
    return %c0_i32, %arg0 : i32, i32
  }
}

</mosaic_0001>

<bundles_post_ra>
// kernel: tpu_custom_call.1
= control target key start
LH: loop header
LB: loop body
LE: loop exit
PB: predicated region body
PF: predicated region fallthrough
CT: control target
= control target key end

     0   :  { %7 = vsyncpa [#allocation3], 0  ;;  %s282_s0 = inlined_call_operand.hbm [shape: f32[96,128], index: 0, kind: input, shape index: {}]   ;;  %s283_s1 = inlined_call_operand.hbm [shape: f32[24,128], index: 1, kind: input, shape index: {}]   ;;  %s284_s2 = inlined_call_operand.hbm [shape: f32[1,128], index: 2, kind: output, shape index: {}]  }
   0x1   :  { %8 = vsyncpa [#allocation6], 0 }
   0x2   :  { %9 = vsyncpa [#allocation4], 0  ;;  %s14_s11 = sshll.u32 %s282_s0, 4  ;;  %s253_s12 = smov [#allocation2]   ;;  %s15_s11 = int_to_ptr.hbm [resolvable:$true] %s14_s11 }
   0x3   :  { %s16_s13 = sshll.u32 %s253_s12, 4  ;;  %s27_s16 = sshll.u32 %s283_s1, 4  ;;  %s17_s13 = int_to_ptr.vmem [resolvable:$true] %s16_s13  ;;  %s28_s16 = int_to_ptr.hbm [resolvable:$true] %s27_s16 }
   0x4   :  { %s254_s17 = smov 128   ;;  %s255_s18 = smov 8  }
   0x5   :  { %22 = dma.hbm_to_vmem [thread:$0]  %s15_s11, 1536, %s17_s13, [#allocation3], %s254_s17, %s254_s17, %s255_s18  }
   0x6   :  { %s256_s19 = smov [#allocation5]  }
   0x7   :  { %s29_s20 = sshll.u32 %s256_s19, 4  ;;  %s30_s20 = int_to_ptr.vmem [resolvable:$true] %s29_s20 }
   0x8   :  { %35 = dma.hbm_to_vmem [thread:$0]  %s28_s16, 384, %s30_s20, [#allocation6], %s254_s17, %s254_s17, %s255_s18  }
   0x9   :  { %247 = dma.done.wait [#allocation3], 1536  }
   0xa   :  { %248 = vsyncadd [#allocation3], 4294965760 }
   0xb   :  { %249 = dma.done.wait [#allocation6], 384  }
   0xc   :  { %250 = vsyncadd [#allocation6], 4294966912  ;;  %v44_v0 = vld [vmem:[#allocation2] sm:$0xff]  ;;  %v45_v1 = vld [vmem:[#allocation2 + $0x8] sm:$0xff]  ;;  %s257_s0 = smov [#allocation7]   ;;  %s155_s23 = sshll.u32 %s284_s2, 4  ;;  %s156_s23 = int_to_ptr.hbm [resolvable:$true] %s155_s23 }
   0xd   :  { %v46_v2 = vld [vmem:[#allocation2 + $0x10] sm:$0xff]  ;;  %v47_v3 = vld [vmem:[#allocation2 + $0x18] sm:$0xff]  ;;  %v48_v4 = vld [vmem:[#allocation2 + $0x20] sm:$0xff]  ;;  %s153_s1 = sshll.u32 %s257_s0, 4  ;;  %s154_s1 = int_to_ptr.vmem [resolvable:$true] %s153_s1 }
   0xe   :  { %v49_v5 = vld [vmem:[#allocation2 + $0x28] sm:$0xff]  ;;  %v50_v6 = vld [vmem:[#allocation2 + $0x30] sm:$0xff]  ;;  %v51_v7 = vld [vmem:[#allocation2 + $0x38] sm:$0xff]  ;;  %v76_v9 = vsub.f32 %v44_v0, %v48_v4 }
   0xf   :  { %v52_v8 = vld [vmem:[#allocation2 + $0x40] sm:$0xff]  ;;  %v77_v10 = vsub.f32 %v45_v1, %v49_v5  ;;  %v53_v11 = vld [vmem:[#allocation2 + $0x48] sm:$0xff]  ;;  %v54_v12 = vld [vmem:[#allocation2 + $0x50] sm:$0xff]  ;;  %v78_v14 = vsub.f32 %v46_v2, %v50_v6  ;;  %v79_v15 = vsub.f32 %v47_v3, %v51_v7 }
  0x10   :  { %v55_v13 = vld [vmem:[#allocation2 + $0x58] sm:$0xff]  ;;  %v109_v16 = vsub.f32 %v44_v0, %v52_v8  ;;  %v80_v17 = vadd.f32 1e-06, %v76_v9  ;;  %v110_v18 = vsub.f32 %v45_v1, %v53_v11  ;;  %v111_v19 = vsub.f32 %v46_v2, %v54_v12  ;;  %v56_v39 = vld [vmem:[#allocation5] sm:$0xff]  ;;  %v57_v40 = vld [vmem:[#allocation5 + $0x8] sm:$0xff] }
  0x11   :  { %v112_v20 = vsub.f32 %v47_v3, %v55_v13  ;;  %v81_v21 = vadd.f32 1e-06, %v77_v10  ;;  %v82_v22 = vadd.f32 1e-06, %v78_v14  ;;  %v83_v23 = vadd.f32 1e-06, %v79_v15 }
  0x12   :  { %v84_v24 = vmul.f32 %v80_v17, %v80_v17  ;;  %v113_v25 = vadd.f32 1e-06, %v109_v16  ;;  %v114_v26 = vadd.f32 1e-06, %v110_v18  ;;  %v115_v29 = vadd.f32 1e-06, %v111_v19 }
  0x13   :  { %v85_v27 = vmul.f32 %v81_v21, %v81_v21  ;;  %v86_v28 = vmul.f32 %v82_v22, %v82_v22  ;;  %v116_v30 = vadd.f32 1e-06, %v112_v20  ;;  %v87_v32 = vmul.f32 %v83_v23, %v83_v23  ;;  %v58_v41 = vld [vmem:[#allocation5 + $0x10] sm:$0xff] }
  0x14   :  { %v117_v31 = vmul.f32 %v113_v25, %v113_v25  ;;  %v118_v34 = vmul.f32 %v114_v26, %v114_v26  ;;  %v119_v35 = vmul.f32 %v115_v29, %v115_v29  ;;  %v59_v46 = vsub.f32 %v56_v39, %v57_v40 }
  0x15   :  { %v88_v33 = vadd.f32 %v85_v27, %v84_v24  ;;  %v120_v37 = vmul.f32 %v116_v30, %v116_v30  ;;  %v67_v47 = vsub.f32 %v56_v39, %v58_v41 }
  0x16   :  { %v121_v38 = vadd.f32 %v118_v34, %v117_v31  ;;  %v60_v52 = vand.u32 2147483647, %v59_v46 }
  0x17   :  { %v89_v36 = vadd.f32 %v88_v33, %v86_v28  ;;  %v68_v53 = vand.u32 2147483647, %v67_v47 }
  0x18   :  { %v122_v43 = vadd.f32 %v121_v38, %v119_v35  ;;  %v61_v58 = vrot.slane %v60_v52, 4 }
  0x19   :  { %v90_v42 = vadd.f32 %v89_v36, %v87_v32  ;;  %v69_v59 = vrot.slane %v68_v53, 4 }
  0x1a   :  { %v123_v45 = vadd.f32 %v122_v43, %v120_v37  ;;  %v62_v62 = vadd.f32 %v61_v58, %v60_v52 }
  0x1b   :  { %v91_v44 = vrot.slane %v90_v42, 4  ;;  %v70_v63 = vadd.f32 %v69_v59, %v68_v53 }
  0x1c   :  { %v124_v49 = vrot.slane %v123_v45, 4  ;;  %v63_v1 = vrot.slane %v62_v62, 2 }
  0x1d   :  { %v92_v48 = vadd.f32 %v91_v44, %v90_v42  ;;  %v71_v2 = vrot.slane %v70_v63, 2 }
  0x1e   :  { %v125_v51 = vadd.f32 %v124_v49, %v123_v45  ;;  %v64_v6 = vadd.f32 %v63_v1, %v62_v62 }
  0x1f   :  { %v93_v50 = vrot.slane %v92_v48, 2  ;;  %v72_v7 = vadd.f32 %v71_v2, %v70_v63 }
  0x20   :  { %v126_v55 = vrot.slane %v125_v51, 2  ;;  %v65_v12 = vrot.slane %v64_v6, 1 }
  0x21   :  { %v94_v54 = vadd.f32 %v93_v50, %v92_v48  ;;  %v73_v13 = vrot.slane %v72_v7, 1 }
  0x22   :  { %v127_v57 = vadd.f32 %v126_v55, %v125_v51  ;;  %v66_v18 = vadd.f32 %v65_v12, %v64_v6 }
  0x23   :  { %v95_v56 = vrot.slane %v94_v54, 1  ;;  %v74_v19 = vadd.f32 %v73_v13, %v72_v7 }
  0x24   :  { %v128_v61 = vrot.slane %v127_v57, 1 }
  0x25   :  { %v96_v60 = vadd.f32 %v95_v56, %v94_v54  ;;  %vm75_vm4 = vcmp.ge.f32.partialorder %v66_v18, %v74_v19 }
  0x26   :  { %v129_v0 = vadd.f32 %v128_v61, %v127_v57 }
  0x27   :  { %171 = vrsqrt.f32 %v96_v60  ;;  %vm104_vm0 = vcmp.eq.f32.partialorder %v96_v60, inf  ;;  %v107_v21 = vand.u32 2147483648, %v96_v60  ;;  %vm106_vm1 = vcmp.eq.f32.partialorder %v96_v60, 0.0 }
  0x28   :  { %173 = vrsqrt.f32 %v129_v0  ;;  %vm137_vm2 = vcmp.eq.f32.partialorder %v129_v0, inf  ;;  %v140_v24 = vand.u32 2147483648, %v129_v0  ;;  %vm139_vm3 = vcmp.eq.f32.partialorder %v129_v0, 0.0 }
  0x2d   :  { %v172_v3 = vpop.eup %171 }
  0x2e   :  { %v98_v4 = vmul.f32 %v172_v3, %v96_v60  ;;  %v174_v5 = vpop.eup %173 }
  0x2f   :  { %v131_v9 = vmul.f32 %v174_v5, %v129_v0 }
  0x30   :  { %v99_v8 = vmul.f32 %v172_v3, %v98_v4 }
  0x31   :  { %v132_v11 = vmul.f32 %v174_v5, %v131_v9 }
  0x32   :  { %v100_v10 = vmul.f32 0.5, %v99_v8 }
  0x33   :  { %v133_v15 = vmul.f32 0.5, %v132_v11 }
  0x34   :  { %v101_v14 = vsub.f32 1.5, %v100_v10 }
  0x35   :  { %v134_v17 = vsub.f32 1.5, %v133_v15 }
  0x36   :  { %v102_v16 = vmul.f32 %v172_v3, %v101_v14 }
  0x37   :  { %v135_v22 = vmul.f32 %v174_v5, %v134_v17 }
  0x38   :  { %v103_v20 = vmul.f32 %v102_v16, %v96_v60 }
  0x39   :  { %v136_v25 = vmul.f32 %v135_v22, %v129_v0 }
  0x3a   :  { %v105_v23 = vsel %vm104_vm0, %v96_v60, %v103_v20 }
  0x3b   :  { %v108_v26 = vsel %vm106_vm1, %v107_v21, %v105_v23  ;;  %v138_v27 = vsel %vm137_vm2, %v129_v0, %v136_v25 }
  0x3c   :  { %v141_v28 = vsel %vm139_vm3, %v140_v24, %v138_v27 }
  0x3d   :  { %v142_v29 = vsel %vm75_vm4, %v141_v28, %v108_v26  ;;  %v143_v30 = vsel %vm75_vm4, %v108_v26, %v141_v28 }
  0x3e   :  { %v144_v31 = vsub.f32 %v142_v29, %v143_v30 }
  0x40   :  { %v145_v32 = vadd.f32 0.5, %v144_v31 }
  0x42   :  { %v146_v33 = vmax.f32 %v145_v32, 0.0 }
  0x44   :  { %147 = vst [vmem:[#allocation7] sm:$0x1] %v146_v33 }
  0x45   :  { %158 = dma.vmem_to_hbm [thread:$0]  %s154_s1, 16, %s156_s23, [#allocation4]  }
  0x46   :  { %251 = dma.done.wait [#allocation4], 16  }
  0x47   :  { %252 = vsyncadd [#allocation4], 4294967280 }
  0x48   :  { %163 = vsyncpa [#allocation3], 1 }
  0x49   :  { %164 = vsyncpa [#allocation6], 1 }
  0x4a   :  { %165 = vsyncpa [#allocation4], 1 }

</bundles_post_ra>
